<compile_context>
chip_gen: v5e
topology: v5e:2x2
jax: 0.10.0
libtpu: 0.0.40
codegen_flags: <defaults>
</compile_context>

<pallas_src>
import functools

import jax
import jax.numpy as jnp
import numpy as np
from jax.experimental import pallas as pl
from jax.experimental.pallas import tpu as pltpu


# ----------------------------------------------------------------------------
# Kernel 0: L2-normalize the prompt keys (tiny, runs once)
# ----------------------------------------------------------------------------
def _key_norm_kernel(key_ref, keynorm_ref):
    eps = jnp.float32(1e-12)
    k = key_ref[...]                                           # (P, C)
    k_ss = jnp.sum(k * k, axis=-1, keepdims=True)
    keynorm_ref[...] = k * jax.lax.rsqrt(jnp.maximum(k_ss, eps))


# ----------------------------------------------------------------------------
# Kernel 1: per-batch-tile token mean, L2-normalize, similarity matmul
#   grid = (B // TB,), fully parallel (megacore-shardable on v7x).
# ----------------------------------------------------------------------------
def _xnorm_sim_kernel(x_ref, keynorm_ref, xnorm_ref, sim_ref):
    eps = jnp.float32(1e-12)

    x = x_ref[...]                                             # (TB, N, C)
    x_mean = jnp.mean(x, axis=1)                               # (TB, C)  'mean'

    x_ss = jnp.sum(x_mean * x_mean, axis=-1, keepdims=True)
    x_norm = x_mean * jax.lax.rsqrt(jnp.maximum(x_ss, eps))    # l2_normalize

    xnorm_ref[...] = x_norm
    sim_ref[...] = jnp.dot(x_norm, keynorm_ref[...].T,
                           preferred_element_type=jnp.float32)  # (TB, P)


# ----------------------------------------------------------------------------
# Kernel 2: per-batch gather of K prompts / keys + fused concat with x_embed.
#   grid = (B,), idx scalar-prefetched into SMEM, prompt pool / prompt_norm
#   resident in VMEM (tiny), one full-block lane-dense store per step.
# ----------------------------------------------------------------------------
def _gather_concat_kernel(idx_ref, prompt_ref, keynorm_ref, x_ref,
                          out_ref, selkey_ref, *, top_k):
    b = pl.program_id(0)

    # Gather the K selected prompts / keys for this batch element.
    prompt_parts = []
    key_parts = []
    for k in range(top_k):                                     # K is small; unrolled
        j = idx_ref[b * top_k + k]                             # SMEM scalar read
        prompt_parts.append(prompt_ref[j])                     # (L, C)
        key_parts.append(keynorm_ref[j])                       # (1, C)

    # Fused concat: [selected prompts ; x_embed[b]] written as ONE aligned block.
    out_ref[0] = jnp.concatenate(prompt_parts + [x_ref[0]], axis=0)   # (K*L+N, C)
    selkey_ref[0] = jnp.concatenate(key_parts, axis=0)                # (K, C)


# ----------------------------------------------------------------------------
# Helpers
# ----------------------------------------------------------------------------
def _pick_batch_tile(B, N, C, budget_bytes=16 << 20):
    """Largest batch tile whose double-buffered f32 x_embed window fits budget."""
    per_row = 2 * N * C * 4
    tb = min(B, max(1, budget_bytes // max(per_row, 1)))
    if tb >= B:
        return B
    # Keep the (TB, C)/(TB, P) output blocks sublane-aligned and TB | B.
    tb = max(8, (tb // 8) * 8)
    while tb > 8 and B % tb != 0:
        tb -= 8
    if B % tb != 0:
        return B
    return tb


# ----------------------------------------------------------------------------
# Wrapper: full Prompt.forward (prompt_pool=True, embedding_key='mean',
# prompt_mask=None, batchwise_prompt=False)
# ----------------------------------------------------------------------------
def prompt_forward(x_embed, prompt, prompt_key, *, top_k):
    B, N, C = x_embed.shape
    P, L, _ = prompt.shape
    K = top_k
    total_len = K * L + N

    # ---- kernel 0: normalize prompt keys once ----
    prompt_norm = pl.pallas_call(
        _key_norm_kernel,
        out_shape=jax.ShapeDtypeStruct((P, C), jnp.float32),
    )(prompt_key.astype(jnp.float32))

    # ---- kernel 1: batch-tiled mean + normalize + similarity ----
    TB = _pick_batch_tile(B, N, C)
    x_norm, similarity = pl.pallas_call(
        _xnorm_sim_kernel,
        out_shape=(
            jax.ShapeDtypeStruct((B, C), jnp.float32),   # x_embed_norm
            jax.ShapeDtypeStruct((B, P), jnp.float32),   # similarity
        ),
        grid=(B // TB,),
        in_specs=[
            pl.BlockSpec((TB, N, C), lambda i: (i, 0, 0)),   # x_embed tile
            pl.BlockSpec((P, C), lambda i: (0, 0)),          # prompt_norm (resident)
        ],
        out_specs=(
            pl.BlockSpec((TB, C), lambda i: (i, 0)),
            pl.BlockSpec((TB, P), lambda i: (i, 0)),
        ),
        compiler_params=pltpu.CompilerParams(
            dimension_semantics=("parallel",)),
    )(x_embed.astype(jnp.float32), prompt_norm)

    # ---- top-k selection (tiny, data-dependent control) ----
    sim_values, idx = jax.lax.top_k(similarity, K)             # (B, K)
    idx = idx.astype(jnp.int32)
    idx_flat = idx.reshape(B * K)

    # reduce_sim == sum_b,k <prompt_norm[idx[b,k]], x_norm[b]> / B
    #            == sum of selected similarity entries / B
    reduce_sim = jnp.sum(sim_values) / jnp.float32(B)

    prompt_norm3 = prompt_norm.reshape(P, 1, C)

    # ---- kernel 2: gather selected prompts / keys + fused concat ----
    kernel2 = functools.partial(_gather_concat_kernel, top_k=K)
    prompted_embedding, selected_key = pl.pallas_call(
        kernel2,
        out_shape=(
            jax.ShapeDtypeStruct((B, total_len, C), jnp.float32),  # [prompts ; x_embed]
            jax.ShapeDtypeStruct((B, K, C), jnp.float32),          # selected keys
        ),
        grid_spec=pltpu.PrefetchScalarGridSpec(
            num_scalar_prefetch=1,
            grid=(B,),
            in_specs=[
                pl.BlockSpec((P, L, C), lambda b, idx: (0, 0, 0)),  # prompt pool (resident)
                pl.BlockSpec((P, 1, C), lambda b, idx: (0, 0, 0)),  # prompt_norm (resident)
                pl.BlockSpec((1, N, C), lambda b, idx: (b, 0, 0)),  # x_embed row
            ],
            out_specs=(
                pl.BlockSpec((1, total_len, C), lambda b, idx: (b, 0, 0)),
                pl.BlockSpec((1, K, C), lambda b, idx: (b, 0, 0)),
            ),
        ),
        compiler_params=pltpu.CompilerParams(
            dimension_semantics=("parallel",)),
    )(idx_flat, prompt.astype(jnp.float32), prompt_norm3,
      x_embed.astype(jnp.float32))

    out = {
        "prompt_idx": idx,
        "prompt_norm": prompt_norm,
        "x_embed_norm": x_norm,
        "similarity": similarity,
        "selected_key": selected_key,
        "reduce_sim": reduce_sim,
        "total_prompt_len": total_len - N,
        "prompted_embedding": prompted_embedding,
    }
    return out


# ----------------------------------------------------------------------------
# Pure-JAX reference (sanity check)
# ----------------------------------------------------------------------------
def _reference(x_embed, prompt, prompt_key, top_k):
    eps = 1e-12
    B = x_embed.shape[0]
    x_mean = jnp.mean(x_embed, axis=1)
    x_norm = x_mean * jax.lax.rsqrt(
        jnp.maximum(jnp.sum(x_mean ** 2, -1, keepdims=True), eps))
    k_norm = prompt_key * jax.lax.rsqrt(
        jnp.maximum(jnp.sum(prompt_key ** 2, -1, keepdims=True), eps))
    sim = x_norm @ k_norm.T
    _, idx = jax.lax.top_k(sim, top_k)
    bp = prompt[idx].reshape(B, -1, prompt.shape[-1])
    selk = k_norm[idx]
    reduce_sim = jnp.sum(selk * x_norm[:, None, :]) / B
    return sim, bp, selk, reduce_sim


if __name__ == "__main__":
    # Small-but-consistent shapes: pool_size=10, length=5, top_k=5, embed_dim=128
    B, N, C = 2, 8, 128
    P, L, K = 10, 5, 5

    key = jax.random.PRNGKey(0)
    k1, k2, k3 = jax.random.split(key, 3)

    # Deterministic parameter init matching nn.init.uniform_(-1, 1)
    prompt = jax.random.uniform(k1, (P, L, C), jnp.float32, minval=-1.0, maxval=1.0)
    prompt_key = jax.random.uniform(k2, (P, C), jnp.float32, minval=-1.0, maxval=1.0)
    x_embed = jax.random.normal(k3, (B, N, C), jnp.float32)

    out = prompt_forward(x_embed, prompt, prompt_key, top_k=K)
    jax.block_until_ready(out["prompted_embedding"])

    # sanity check against pure-JAX reference
    ref_sim, ref_bp, ref_selk, ref_rsum = _reference(x_embed, prompt, prompt_key, K)
    np.testing.assert_allclose(np.asarray(out["similarity"]), np.asarray(ref_sim),
                               rtol=1e-5, atol=1e-5)
    np.testing.assert_allclose(
        np.asarray(out["prompted_embedding"][:, :K * L, :]), np.asarray(ref_bp),
        rtol=1e-5, atol=1e-5)
    np.testing.assert_allclose(
        np.asarray(out["prompted_embedding"][:, K * L:, :]), np.asarray(x_embed),
        rtol=1e-6, atol=1e-6)
    np.testing.assert_allclose(np.asarray(out["selected_key"]), np.asarray(ref_selk),
                               rtol=1e-5, atol=1e-5)
    np.testing.assert_allclose(np.asarray(out["reduce_sim"]), np.asarray(ref_rsum),
                               rtol=1e-5, atol=1e-5)
    assert out["total_prompt_len"] == K * L
    assert out["prompted_embedding"].shape == (B, K * L + N, C)

    print("KERNEL_OK")
</pallas_src>

<mosaic_0001>
module attributes {stable_mosaic.version = 11 : i64} {
  func.func @_key_norm_kernel(%arg0: memref<10x128xf32, #tpu.memory_space<vmem>>, %arg1: memref<10x128xf32, #tpu.memory_space<vmem>>) attributes {dimension_semantics = [], scalar_prefetch = 0 : i64, scratch_operands = 0 : i64, tpu.core_type = #tpu.core_type<tc>} {
    %c0 = arith.constant 0 : index
    %c0_0 = arith.constant 0 : index
    %0 = vector.load %arg0[%c0, %c0_0] : memref<10x128xf32, #tpu.memory_space<vmem>>, vector<10x128xf32>
    %1 = arith.mulf %0, %0 : vector<10x128xf32>
    %cst = arith.constant dense<0.000000e+00> : vector<10xf32>
    %2 = vector.multi_reduction <add>, %1, %cst [1] : vector<10x128xf32> to vector<10xf32>
    %3 = vector.shape_cast %2 : vector<10xf32> to vector<10x1xf32>
    %cst_1 = arith.constant 9.99999996E-13 : f32
    %4 = vector.broadcast %cst_1 : f32 to vector<10x1xf32>
    %5 = arith.maximumf %3, %4 : vector<10x1xf32>
    %6 = math.rsqrt %5 : vector<10x1xf32>
    %7 = vector.broadcast %6 : vector<10x1xf32> to vector<10x128xf32>
    %8 = arith.mulf %0, %7 : vector<10x128xf32>
    %c0_2 = arith.constant 0 : index
    %c0_3 = arith.constant 0 : index
    %9 = vector.load %arg1[%c0_2, %c0_3] : memref<10x128xf32, #tpu.memory_space<vmem>>, vector<10x128xf32>
    tpu.vector_store %arg1[%c0_2, %c0_3], %8 {strides = array<i32>} : memref<10x128xf32, #tpu.memory_space<vmem>>, vector<10x128xf32>,
    return
  }
}

</mosaic_0001>

<bundles_post_ra>
// kernel: tpu_custom_call.1
= control target key start
LH: loop header
LB: loop body
LE: loop exit
PB: predicated region body
PF: predicated region fallthrough
CT: control target
= control target key end

     0   :  { %6 = vsyncpa [#allocation3], 0  ;;  %s166_s0 = inlined_call_operand.hbm [shape: f32[10,128], index: 0, kind: input, shape index: {}]   ;;  %s167_s1 = inlined_call_operand.hbm [shape: f32[10,128], index: 1, kind: output, shape index: {}]  }
   0x1   :  { %7 = vsyncpa [#allocation4], 0  ;;  %s12_s8 = sshll.u32 %s166_s0, 4  ;;  %s140_s9 = smov [#allocation2]   ;;  %s13_s8 = int_to_ptr.hbm [resolvable:$true] %s12_s8 }
   0x2   :  { %s14_s10 = sshll.u32 %s140_s9, 4  ;;  %s141_s11 = smov 128   ;;  %s15_s10 = int_to_ptr.vmem [resolvable:$true] %s14_s10 }
   0x3   :  { %s142_s12 = smov 8  }
   0x4   :  { %20 = dma.hbm_to_vmem [thread:$0]  %s13_s8, 256, %s15_s10, [#allocation3], %s141_s11, %s141_s11, %s142_s12  }
   0x5   :  { %136 = dma.done.wait [#allocation3], 256  }
   0x6   :  { %137 = vsyncadd [#allocation3], 4294967040  ;;  %v25_v0 = vld [vmem:[#allocation2] sm:$0xff]  ;;  %v26_v2 = vld [vmem:[#allocation2 + $0x8] sm:$0x3]  ;;  %vm31_vm0 = vcmask 1041408  }
   0x7   :  { %v27_v1 = vmul.f32 %v25_v0, %v25_v0  ;;  %v28_v3 = vmul.f32 %v26_v2, %v26_v2  ;;  %s143_s0 = smov [#allocation5]   ;;  %s67_s16 = sshll.u32 %s167_s1, 4  ;;  %s68_s16 = int_to_ptr.hbm [resolvable:$true] %s67_s16 }
   0x8   :  { %s65_s13 = sshll.u32 %s143_s0, 4  ;;  %s66_s13 = int_to_ptr.vmem [resolvable:$true] %s65_s13 }
   0x9   :  { %29 = vadd.xlane.f32.xlu0 %v27_v1  ;;  %v32_v4 = vsel %vm31_vm0, %v28_v3, 0.0 }
  0x11   :  { %33 = vadd.xlane.f32.xlu0 %v32_v4 }
  0x7c   :  { %v30_v5 = vpop.xlane.xlu0 %29 }
  0x7d   :  { %v35_v6 = vmax.f32 %v30_v5, 1e-12 }
  0x7f   :  { %84 = vrsqrt.f32 %v35_v6  ;;  %vm43_vm2 = vweird.f32 %v35_v6 }
  0x84   :  { %v34_v7 = vpop.xlane.xlu0 %33 }
  0x85   :  { %v85_v8 = vpop.eup %84  ;;  %v36_v9 = vmax.f32 %v34_v7, 1e-12 }
  0x86   :  { %v38_v10 = vmul.f32 %v85_v8, %v35_v6  ;;  %vm44_vm1 = vweird.f32 %v85_v8 }
  0x87   :  { %86 = vrsqrt.f32 %v36_v9  ;;  %vm45_vm3 = vmor %vm43_vm2, %vm44_vm1  ;;  %vm53_vm5 = vweird.f32 %v36_v9 }
  0x88   :  { %v39_v11 = vmul.f32 %v85_v8, %v38_v10 }
  0x8a   :  { %v40_v12 = vmul.f32 0.5, %v39_v11 }
  0x8c   :  { %v41_v13 = vsub.f32 1.5, %v40_v12 }
  0x8d   :  { %v87_v14 = vpop.eup %86 }
  0x8e   :  { %v42_v15 = vmul.f32 %v85_v8, %v41_v13  ;;  %v48_v16 = vmul.f32 %v87_v14, %v36_v9  ;;  %vm54_vm4 = vweird.f32 %v87_v14 }
  0x8f   :  { %vm55_vm6 = vmor %vm53_vm5, %vm54_vm4 }
  0x90   :  { %v46_v17 = vsel %vm45_vm3, %v85_v8, %v42_v15  ;;  %v49_v18 = vmul.f32 %v87_v14, %v48_v16 }
  0x91   :  { %v57_v19 = vmul.f32 %v46_v17, %v25_v0 }
  0x92   :  { %v50_v20 = vmul.f32 0.5, %v49_v18 }
  0x93   :  { %59 = vst [vmem:[#allocation5] sm:$0xff] %v57_v19 }
  0x94   :  { %v51_v21 = vsub.f32 1.5, %v50_v20 }
  0x96   :  { %v52_v22 = vmul.f32 %v87_v14, %v51_v21 }
  0x98   :  { %v56_v23 = vsel %vm55_vm6, %v87_v14, %v52_v22 }
  0x99   :  { %v58_v24 = vmul.f32 %v56_v23, %v26_v2 }
  0x9b   :  { %60 = vst [vmem:[#allocation5 + $0x8] sm:$0x3] %v58_v24 }
  0x9c   :  { %73 = dma.vmem_to_hbm [thread:$0]  %s66_s13, 256, %s68_s16, [#allocation4], %s141_s11, %s141_s11, %s142_s12  }
  0x9d   :  { %138 = dma.done.wait [#allocation4], 256  }
  0x9e   :  { %139 = vsyncadd [#allocation4], 4294967040 }
  0x9f   :  { %78 = vsyncpa [#allocation3], 1 }
  0xa0   :  { %79 = vsyncpa [#allocation4], 1 }

</bundles_post_ra>
